<compile_context>
chip_gen: v7x
topology: tpu7x:2x2x1
jax: 0.10.0
libtpu: 0.0.40
codegen_flags: <defaults>
</compile_context>

<pallas_src>
import functools

import jax
import jax.numpy as jnp
from jax.experimental import pallas as pl
from jax.experimental.pallas import tpu as pltpu

_LANE = 128


def _round_up(x, m):
    return (x + m - 1) // m * m


# ---------------------------------------------------------------------------
# Hardware-aware configuration (host-side / trace-time, cheap).
# ---------------------------------------------------------------------------
def _tpu_config():
    """Returns (vmem_budget_bytes, multi_core_chip, bf16_eup_ok)."""
    kind = ""
    try:
        kind = (jax.devices()[0].device_kind or "").lower()
    except Exception:
        pass

    vmem_cap = None
    try:
        vmem_cap = int(pltpu.get_tpu_info().vmem_capacity_bytes)
    except Exception:
        vmem_cap = None
    if vmem_cap is None or vmem_cap <= 0:
        # v7x has 64 MiB / TC; v5e/v6e have 128 MiB.
        vmem_cap = (64 << 20) if "v7" in kind else (128 << 20)

    # Leave headroom (>=12 MiB / ~20%) for compiler-internal scratch and
    # buffers outside our accounting: ~51 MiB on v7x, ~102 MiB on v5e/v6e.
    budget = min(vmem_cap - (12 << 20), int(vmem_cap * 0.8))
    budget = max(budget, 32 << 20)

    multi_core_chip = "v7" in kind                      # 2 TensorCores/chip
    bf16_eup_ok = ("v6" in kind) or ("v7" in kind)      # v5e: no bf16 VPU/EUP
    return budget, multi_core_chip, bf16_eup_ok


# ---------------------------------------------------------------------------
# Kernel
# ---------------------------------------------------------------------------
def _five_layer_kernel(*refs, n_sub, sub_rows, act_dtype):
    """refs = (x, w1, b1, ..., w5, b5, out)."""
    x_ref = refs[0]
    o_ref = refs[-1]
    wb = refs[1:-1]

    # Independent row sub-tiles: sub-tile j+1's 5-layer chain has no data
    # dependence on sub-tile j, so the scheduler can overlap one sub-tile's
    # MXU matmul with another's VPU/EUP bias+tanh epilogue.
    for j in range(n_sub):
        r0 = j * sub_rows
        h = x_ref[r0:r0 + sub_rows, :]
        for li in range(0, len(wb), 2):
            w_ref = wb[li]
            b_ref = wb[li + 1]
            # MXU matmul in the weight dtype (bf16 or f32), f32 accumulation.
            acc = jnp.dot(h.astype(w_ref.dtype), w_ref[...],
                          preferred_element_type=jnp.float32)
            # Bias add in f32; tanh in bf16 on v6e/v7x (packs 2 elems/lane and
            # drops the f32->bf16 cast at the next dot), f32 otherwise.
            h = jnp.tanh((acc + b_ref[...]).astype(act_dtype))
        o_ref[r0:r0 + sub_rows, :] = h.astype(o_ref.dtype)


# ---------------------------------------------------------------------------
# Parameter preparation (call ONCE, outside the hot path)
# ---------------------------------------------------------------------------
def prepare_params(params, compute_dtype=jnp.bfloat16):
    """Pad every layer's output dim to a lane (128) multiple and cast weights
    to the compute dtype.  Padded lanes are exactly zero, so results in the
    real columns are unchanged.  The layer-0 input dim is left unpadded (it
    only feeds the MXU contraction)."""
    dims = [params[0][0].shape[0]] + [w.shape[1] for (w, _) in params]
    dims_p = [dims[0]] + [_round_up(d, _LANE) for d in dims[1:]]
    padded = []
    for li, (w, b) in enumerate(params):
        fi, fo = w.shape
        fi_p, fo_p = dims_p[li], dims_p[li + 1]
        w_p = jnp.zeros((fi_p, fo_p), compute_dtype)
        w_p = w_p.at[:fi, :fo].set(w.astype(compute_dtype))
        b_p = jnp.zeros((1, fo_p), jnp.float32)
        b_p = b_p.at[:, :fo].set(b.astype(jnp.float32).reshape(1, fo))
        padded.append((w_p, b_p))
    return tuple(padded)


# ---------------------------------------------------------------------------
# Forward
# ---------------------------------------------------------------------------
@functools.partial(jax.jit, static_argnames=("out_features", "block_rows"))
def five_layer_net(x, padded_params, *, out_features, block_rows=None):
    """padded_params from prepare_params(); w_i is [in, out], b_i is [1, out]."""
    n, d_in = x.shape
    out_dtype = x.dtype
    compute_dtype = padded_params[0][0].dtype
    d_out_p = padded_params[-1][0].shape[1]

    vmem_budget, multi_core, bf16_eup = _tpu_config()

    act_dtype = (jnp.bfloat16
                 if (compute_dtype == jnp.bfloat16 and bf16_eup)
                 else jnp.float32)

    # ---- row tiling --------------------------------------------------------
    row_unit = 16 if compute_dtype == jnp.bfloat16 else 8
    if block_rows is None:
        block_rows = 512 if multi_core else 1024   # v7x has half the VMEM
    bm = _round_up(min(block_rows, _round_up(n, row_unit)), row_unit)

    # v7x: keep >=2 grid steps so the ("parallel",) axis shards across both
    # TensorCores (one-step grids leave a core idle).
    if multi_core and n > row_unit:
        bm = min(bm, _round_up((n + 1) // 2, row_unit))
        bm = max(bm, row_unit)

    # ---- shrink bm until the VMEM estimate fits the budget -----------------
    dims_p = [d_in] + [w.shape[1] for (w, _) in padded_params]
    w_bytes = sum(w.size * w.dtype.itemsize for (w, _) in padded_params)  # Buffered(1)
    b_bytes = sum(b.size * b.dtype.itemsize for (_, b) in padded_params)
    h_max = max(dims_p[1:])

    def vmem_est(bm_):
        x_bytes = 2 * bm_ * d_in * x.dtype.itemsize                # in, 2 bufs
        o_bytes = 2 * bm_ * d_out_p * jnp.dtype(out_dtype).itemsize  # out, 2 bufs
        interm = 2 * bm_ * h_max * 4                                # live f32 acc
        return w_bytes + b_bytes + x_bytes + o_bytes + interm

    while bm > row_unit and vmem_est(bm) > vmem_budget:
        bm = _round_up(bm // 2, row_unit)

    grid = (pl.cdiv(n, bm),)

    # ---- in-kernel sub-tiling (MXU/EUP overlap) -----------------------------
    n_sub = 1
    for cand in (4, 2):
        if bm % cand == 0 and (bm // cand) % row_unit == 0:
            n_sub = cand
            break
    sub_rows = bm // n_sub

    # ---- specs --------------------------------------------------------------
    # x passes through unpadded/uncast: full-extent last dim is legal even when
    # d_in is not a multiple of 128; partial last row blocks are handled by
    # Pallas (OOB rows are never written to the output nor consumed).
    in_specs = [pl.BlockSpec((bm, d_in), lambda i: (i, 0))]
    flat = [x]
    for (w_p, b_p) in padded_params:
        # Constant index_map -> resident across grid steps; single-buffer so
        # the resident operands don't pay the default 2x VMEM.
        in_specs.append(pl.BlockSpec(w_p.shape, lambda i: (0, 0),
                                     pipeline_mode=pl.Buffered(1)))
        in_specs.append(pl.BlockSpec(b_p.shape, lambda i: (0, 0),
                                     pipeline_mode=pl.Buffered(1)))
        flat.extend([w_p, b_p])

    out_spec = pl.BlockSpec((bm, d_out_p), lambda i: (i, 0))

    kernel = functools.partial(_five_layer_kernel, n_sub=n_sub,
                               sub_rows=sub_rows, act_dtype=act_dtype)

    out_p = pl.pallas_call(
        kernel,
        out_shape=jax.ShapeDtypeStruct((n, d_out_p), out_dtype),
        grid_spec=pltpu.PrefetchScalarGridSpec(
            num_scalar_prefetch=0,
            grid=grid,
            in_specs=in_specs,
            out_specs=out_spec,
        ),
        compiler_params=pltpu.CompilerParams(
            dimension_semantics=("parallel",),
            vmem_limit_bytes=int(vmem_budget),
        ),
    )(*flat)

    # Drop lane padding on the output features.
    return out_p[:, :out_features]


# ---------------------------------------------------------------------------
# Init / reference
# ---------------------------------------------------------------------------
def init_linear(key, fan_in, fan_out, dtype=jnp.float32):
    """Deterministic init mimicking torch.nn.Linear (U(-1/sqrt(in), 1/sqrt(in)))."""
    kw, kb = jax.random.split(key)
    bound = 1.0 / jnp.sqrt(jnp.asarray(fan_in, dtype))
    # Stored as [in, out] (transposed vs. PyTorch's [out, in]) so kernel does x @ W.
    w = jax.random.uniform(kw, (fan_in, fan_out), dtype, -bound, bound)
    b = jax.random.uniform(kb, (1, fan_out), dtype, -bound, bound)
    return w, b


def reference_forward(x, params):
    h = x
    for (w, b) in params:
        h = jnp.tanh(h @ w + b)
    return h


if __name__ == "__main__":
    # Small shapes consistent with the module: N=8, D_in=32, H=64, D_out=16.
    N, D_in, H, D_out = 8, 32, 64, 16

    key = jax.random.PRNGKey(0)
    kx, k1, k2, k3, k4, k5 = jax.random.split(key, 6)

    x = jax.random.normal(kx, (N, D_in), jnp.float32)
    params = (
        init_linear(k1, D_in, H),
        init_linear(k2, H, H),
        init_linear(k3, H, H),
        init_linear(k4, H, H),
        init_linear(k5, H, D_out),
    )
    ref = reference_forward(x, params)

    # 1) f32 compute path: exact-ish vs. the f32 reference.
    params_f32 = prepare_params(params, compute_dtype=jnp.float32)
    out_f32 = jax.block_until_ready(
        five_layer_net(x, params_f32, out_features=D_out))
    assert out_f32.shape == (N, D_out)
    assert jnp.allclose(out_f32, ref, atol=1e-5, rtol=1e-5)

    # 2) bf16 MXU path (tanh runs in bf16 on v6e/v7x, f32 on v5e).
    params_bf16 = prepare_params(params, compute_dtype=jnp.bfloat16)
    out_bf16 = jax.block_until_ready(
        five_layer_net(x, params_bf16, out_features=D_out))
    assert out_bf16.shape == (N, D_out)
    assert jnp.allclose(out_bf16, ref, atol=5e-2, rtol=5e-2)

    # 3) Non-divisible batch exercising multi-tile grid + partial last block.
    N2 = 200
    x2 = jax.random.normal(jax.random.PRNGKey(1), (N2, D_in), jnp.float32)
    ref2 = reference_forward(x2, params)
    out2 = jax.block_until_ready(
        five_layer_net(x2, params_f32, out_features=D_out, block_rows=128))
    assert out2.shape == (N2, D_out)
    assert jnp.allclose(out2, ref2, atol=1e-5, rtol=1e-5)

    print("KERNEL_OK")
</pallas_src>

<mosaic_0001>
module attributes {stable_mosaic.version = 11 : i64} {
  func.func @_five_layer_kernel(%arg0: i32, %arg1: memref<8x32xf32, #tpu.memory_space<vmem>>, %arg2: memref<32x128xf32, #tpu.memory_space<vmem>>, %arg3: memref<1x128xf32, #tpu.memory_space<vmem>>, %arg4: memref<128x128xf32, #tpu.memory_space<vmem>>, %arg5: memref<1x128xf32, #tpu.memory_space<vmem>>, %arg6: memref<128x128xf32, #tpu.memory_space<vmem>>, %arg7: memref<1x128xf32, #tpu.memory_space<vmem>>, %arg8: memref<128x128xf32, #tpu.memory_space<vmem>>, %arg9: memref<1x128xf32, #tpu.memory_space<vmem>>, %arg10: memref<128x128xf32, #tpu.memory_space<vmem>>, %arg11: memref<1x128xf32, #tpu.memory_space<vmem>>, %arg12: memref<8x128xf32, #tpu.memory_space<vmem>>) attributes {dimension_semantics = [#tpu.dimension_semantics<parallel>], iteration_bounds = array<i64: 1>, scalar_prefetch = 0 : i64, scratch_operands = 0 : i64, tpu.core_type = #tpu.core_type<tc>, window_params = [{transform_indices = @transform_0, window_bounds = array<i64: 8, 32>}, {pipeline_mode = #tpu.pipeline_mode<synchronous>, transform_indices = @transform_1, window_bounds = array<i64: 32, 128>}, {pipeline_mode = #tpu.pipeline_mode<synchronous>, transform_indices = @transform_2, window_bounds = array<i64: 1, 128>}, {pipeline_mode = #tpu.pipeline_mode<synchronous>, transform_indices = @transform_3, window_bounds = array<i64: 128, 128>}, {pipeline_mode = #tpu.pipeline_mode<synchronous>, transform_indices = @transform_4, window_bounds = array<i64: 1, 128>}, {pipeline_mode = #tpu.pipeline_mode<synchronous>, transform_indices = @transform_5, window_bounds = array<i64: 128, 128>}, {pipeline_mode = #tpu.pipeline_mode<synchronous>, transform_indices = @transform_6, window_bounds = array<i64: 1, 128>}, {pipeline_mode = #tpu.pipeline_mode<synchronous>, transform_indices = @transform_7, window_bounds = array<i64: 128, 128>}, {pipeline_mode = #tpu.pipeline_mode<synchronous>, transform_indices = @transform_8, window_bounds = array<i64: 1, 128>}, {pipeline_mode = #tpu.pipeline_mode<synchronous>, transform_indices = @transform_9, window_bounds = array<i64: 128, 128>}, {pipeline_mode = #tpu.pipeline_mode<synchronous>, transform_indices = @transform_10, window_bounds = array<i64: 1, 128>}, {transform_indices = @transform_11, window_bounds = array<i64: 8, 128>}]} {
    %c0 = arith.constant 0 : index
    %c0_0 = arith.constant 0 : index
    %0 = vector.load %arg1[%c0, %c0_0] : memref<8x32xf32, #tpu.memory_space<vmem>>, vector<8x32xf32>
    %c0_1 = arith.constant 0 : index
    %c0_2 = arith.constant 0 : index
    %1 = vector.load %arg2[%c0_1, %c0_2] : memref<32x128xf32, #tpu.memory_space<vmem>>, vector<32x128xf32>
    %cst = arith.constant dense<0.000000e+00> : vector<8x128xf32>
    %2 = tpu.matmul %0, %1, %cst {dimension_numbers = #tpu.dot_dimension_numbers<[1], [0], [0], [1], [0, 0, 1, 1], [], []>} : vector<8x32xf32>, vector<32x128xf32>, vector<8x128xf32> -> vector<8x128xf32>
    %c0_3 = arith.constant 0 : index
    %c0_4 = arith.constant 0 : index
    %3 = vector.load %arg3[%c0_3, %c0_4] : memref<1x128xf32, #tpu.memory_space<vmem>>, vector<1x128xf32>
    %4 = vector.broadcast %3 : vector<1x128xf32> to vector<8x128xf32>
    %5 = arith.addf %2, %4 : vector<8x128xf32>
    %6 = math.tanh %5 : vector<8x128xf32>
    %c0_5 = arith.constant 0 : index
    %c0_6 = arith.constant 0 : index
    %7 = vector.load %arg4[%c0_5, %c0_6] : memref<128x128xf32, #tpu.memory_space<vmem>>, vector<128x128xf32>
    %cst_7 = arith.constant dense<0.000000e+00> : vector<8x128xf32>
    %8 = tpu.matmul %6, %7, %cst_7 {dimension_numbers = #tpu.dot_dimension_numbers<[1], [0], [0], [1], [0, 0, 1, 1], [], []>} : vector<8x128xf32>, vector<128x128xf32>, vector<8x128xf32> -> vector<8x128xf32>
    %c0_8 = arith.constant 0 : index
    %c0_9 = arith.constant 0 : index
    %9 = vector.load %arg5[%c0_8, %c0_9] : memref<1x128xf32, #tpu.memory_space<vmem>>, vector<1x128xf32>
    %10 = vector.broadcast %9 : vector<1x128xf32> to vector<8x128xf32>
    %11 = arith.addf %8, %10 : vector<8x128xf32>
    %12 = math.tanh %11 : vector<8x128xf32>
    %c0_10 = arith.constant 0 : index
    %c0_11 = arith.constant 0 : index
    %13 = vector.load %arg6[%c0_10, %c0_11] : memref<128x128xf32, #tpu.memory_space<vmem>>, vector<128x128xf32>
    %cst_12 = arith.constant dense<0.000000e+00> : vector<8x128xf32>
    %14 = tpu.matmul %12, %13, %cst_12 {dimension_numbers = #tpu.dot_dimension_numbers<[1], [0], [0], [1], [0, 0, 1, 1], [], []>} : vector<8x128xf32>, vector<128x128xf32>, vector<8x128xf32> -> vector<8x128xf32>
    %c0_13 = arith.constant 0 : index
    %c0_14 = arith.constant 0 : index
    %15 = vector.load %arg7[%c0_13, %c0_14] : memref<1x128xf32, #tpu.memory_space<vmem>>, vector<1x128xf32>
    %16 = vector.broadcast %15 : vector<1x128xf32> to vector<8x128xf32>
    %17 = arith.addf %14, %16 : vector<8x128xf32>
    %18 = math.tanh %17 : vector<8x128xf32>
    %c0_15 = arith.constant 0 : index
    %c0_16 = arith.constant 0 : index
    %19 = vector.load %arg8[%c0_15, %c0_16] : memref<128x128xf32, #tpu.memory_space<vmem>>, vector<128x128xf32>
    %cst_17 = arith.constant dense<0.000000e+00> : vector<8x128xf32>
    %20 = tpu.matmul %18, %19, %cst_17 {dimension_numbers = #tpu.dot_dimension_numbers<[1], [0], [0], [1], [0, 0, 1, 1], [], []>} : vector<8x128xf32>, vector<128x128xf32>, vector<8x128xf32> -> vector<8x128xf32>
    %c0_18 = arith.constant 0 : index
    %c0_19 = arith.constant 0 : index
    %21 = vector.load %arg9[%c0_18, %c0_19] : memref<1x128xf32, #tpu.memory_space<vmem>>, vector<1x128xf32>
    %22 = vector.broadcast %21 : vector<1x128xf32> to vector<8x128xf32>
    %23 = arith.addf %20, %22 : vector<8x128xf32>
    %24 = math.tanh %23 : vector<8x128xf32>
    %c0_20 = arith.constant 0 : index
    %c0_21 = arith.constant 0 : index
    %25 = vector.load %arg10[%c0_20, %c0_21] : memref<128x128xf32, #tpu.memory_space<vmem>>, vector<128x128xf32>
    %cst_22 = arith.constant dense<0.000000e+00> : vector<8x128xf32>
    %26 = tpu.matmul %24, %25, %cst_22 {dimension_numbers = #tpu.dot_dimension_numbers<[1], [0], [0], [1], [0, 0, 1, 1], [], []>} : vector<8x128xf32>, vector<128x128xf32>, vector<8x128xf32> -> vector<8x128xf32>
    %c0_23 = arith.constant 0 : index
    %c0_24 = arith.constant 0 : index
    %27 = vector.load %arg11[%c0_23, %c0_24] : memref<1x128xf32, #tpu.memory_space<vmem>>, vector<1x128xf32>
    %28 = vector.broadcast %27 : vector<1x128xf32> to vector<8x128xf32>
    %29 = arith.addf %26, %28 : vector<8x128xf32>
    %30 = math.tanh %29 : vector<8x128xf32>
    %c0_25 = arith.constant 0 : index
    %c0_26 = arith.constant 0 : index
    %31 = vector.load %arg12[%c0_25, %c0_26] : memref<8x128xf32, #tpu.memory_space<vmem>>, vector<8x128xf32>
    tpu.vector_store %arg12[%c0_25, %c0_26], %30 {strides = array<i32>} : memref<8x128xf32, #tpu.memory_space<vmem>>, vector<8x128xf32>,
    return
  }
  func.func @transform_0(%arg0: i32) -> (i32, i32) {
    %c0_i32 = arith.constant 0 : i32
    %c0_i32_0 = arith.constant 0 : i32
    return %arg0, %c0_i32 : i32, i32
  }
  func.func @transform_1(%arg0: i32) -> (i32, i32) {
    %c0_i32 = arith.constant 0 : i32
    %c0_i32_0 = arith.constant 0 : i32
    %c0_i32_1 = arith.constant 0 : i32
    return %c0_i32, %c0_i32_0 : i32, i32
  }
  func.func @transform_2(%arg0: i32) -> (i32, i32) {
    %c0_i32 = arith.constant 0 : i32
    %c0_i32_0 = arith.constant 0 : i32
    %c0_i32_1 = arith.constant 0 : i32
    return %c0_i32, %c0_i32_0 : i32, i32
  }
  func.func @transform_3(%arg0: i32) -> (i32, i32) {
    %c0_i32 = arith.constant 0 : i32
    %c0_i32_0 = arith.constant 0 : i32
    %c0_i32_1 = arith.constant 0 : i32
    return %c0_i32, %c0_i32_0 : i32, i32
  }
  func.func @transform_4(%arg0: i32) -> (i32, i32) {
    %c0_i32 = arith.constant 0 : i32
    %c0_i32_0 = arith.constant 0 : i32
    %c0_i32_1 = arith.constant 0 : i32
    return %c0_i32, %c0_i32_0 : i32, i32
  }
  func.func @transform_5(%arg0: i32) -> (i32, i32) {
    %c0_i32 = arith.constant 0 : i32
    %c0_i32_0 = arith.constant 0 : i32
    %c0_i32_1 = arith.constant 0 : i32
    return %c0_i32, %c0_i32_0 : i32, i32
  }
  func.func @transform_6(%arg0: i32) -> (i32, i32) {
    %c0_i32 = arith.constant 0 : i32
    %c0_i32_0 = arith.constant 0 : i32
    %c0_i32_1 = arith.constant 0 : i32
    return %c0_i32, %c0_i32_0 : i32, i32
  }
  func.func @transform_7(%arg0: i32) -> (i32, i32) {
    %c0_i32 = arith.constant 0 : i32
    %c0_i32_0 = arith.constant 0 : i32
    %c0_i32_1 = arith.constant 0 : i32
    return %c0_i32, %c0_i32_0 : i32, i32
  }
  func.func @transform_8(%arg0: i32) -> (i32, i32) {
    %c0_i32 = arith.constant 0 : i32
    %c0_i32_0 = arith.constant 0 : i32
    %c0_i32_1 = arith.constant 0 : i32
    return %c0_i32, %c0_i32_0 : i32, i32
  }
  func.func @transform_9(%arg0: i32) -> (i32, i32) {
    %c0_i32 = arith.constant 0 : i32
    %c0_i32_0 = arith.constant 0 : i32
    %c0_i32_1 = arith.constant 0 : i32
    return %c0_i32, %c0_i32_0 : i32, i32
  }
  func.func @transform_10(%arg0: i32) -> (i32, i32) {
    %c0_i32 = arith.constant 0 : i32
    %c0_i32_0 = arith.constant 0 : i32
    %c0_i32_1 = arith.constant 0 : i32
    return %c0_i32, %c0_i32_0 : i32, i32
  }
  func.func @transform_11(%arg0: i32) -> (i32, i32) {
    %c0_i32 = arith.constant 0 : i32
    %c0_i32_0 = arith.constant 0 : i32
    return %arg0, %c0_i32 : i32, i32
  }
}

</mosaic_0001>

<bundles_post_ra>
// kernel: five_layer_net.1
= control target key start
LH: loop header
LB: loop body
LE: loop exit
PB: predicated region body
PF: predicated region fallthrough
CT: control target
= control target key end

     0   :  { %16 = vsyncpa [#allocation3], 0  ;;  %s1577_s0 = inlined_call_operand.hbm [shape: f32[8,32], index: 0, kind: input, shape index: {}]   ;;  %s1578_s1 = inlined_call_operand.hbm [shape: f32[32,128], index: 1, kind: input, shape index: {}]   ;;  %s1579_s2 = inlined_call_operand.hbm [shape: f32[1,128], index: 2, kind: input, shape index: {}]   ;;  %s1580_s3 = inlined_call_operand.hbm [shape: f32[128,128], index: 3, kind: input, shape index: {}]   ;;  %s1581_s4 = inlined_call_operand.hbm [shape: f32[1,128], index: 4, kind: input, shape index: {}]   ;;  %s1582_s5 = inlined_call_operand.hbm [shape: f32[128,128], index: 5, kind: input, shape index: {}]   ;;  %s1583_s6 = inlined_call_operand.hbm [shape: f32[1,128], index: 6, kind: input, shape index: {}]   ;;  %s1584_s7 = inlined_call_operand.hbm [shape: f32[128,128], index: 7, kind: input, shape index: {}]   ;;  %s1585_s8 = inlined_call_operand.hbm [shape: f32[1,128], index: 8, kind: input, shape index: {}]   ;;  %s1586_s9 = inlined_call_operand.hbm [shape: f32[128,128], index: 9, kind: input, shape index: {}]   ;;  %s1587_s10 = inlined_call_operand.hbm [shape: f32[1,128], index: 10, kind: input, shape index: {}]   ;;  %s1588_s11 = inlined_call_operand.hbm [shape: f32[8,128], index: 11, kind: output, shape index: {}]  }
   0x1   :  { %17 = vsyncpa [#allocation6], 0 }
   0x2   :  { %18 = vsyncpa [#allocation9], 0 }
   0x3   :  { %19 = vsyncpa [#allocation12], 0 }
   0x4   :  { %20 = vsyncpa [#allocation15], 0 }
   0x5   :  { %21 = vsyncpa [#allocation18], 0 }
   0x6   :  { %22 = vsyncpa [#allocation4], 0  ;;  %s1297_s17 = smov [#allocation5]   ;;  %s1019_s21 = scalar_lea.hbm %s1578_s1, 512 }
   0x7   :  { %s38_s18 = sshll.u32 %s1297_s17, 4  ;;  %p1020_p0 = scmp.ne.s32.totalorder %s1578_s1, %s1019_s21  ;;  %s39_s18 = int_to_ptr.vmem [resolvable:$true] %s38_s18 }
   0x8   :  { %p1023_p1 = scmp.lt.u32.totalorder %s1019_s21, %s1578_s1 }
   0xa   :  { %p1025_p2 = pnand %p1023_p1, %p1020_p0 }
   0xc   :  { %1028 = shalt.err (!%p1025_p2)
}
   0xd   :  { %s1029_s26 = scalar_lea.vmem %s39_s18, 512  ;;  %p1034_p4 = scmp.lt.s32.totalorder %s39_s18, %s39_s18 }
   0xe   :  { %p1030_p3 = scmp.ne.s32.totalorder %s39_s18, %s1029_s26  ;;  %p1035_p5 = scmp.lt.s32.totalorder %s1029_s26, %s1029_s26 }
  0x10   :  { %p1036_p6 = por %p1035_p5, %p1034_p4 }
  0x12   :  { %p1037_p7 = pnand %p1036_p6, %p1030_p3 }
  0x14   :  { %1040 = shalt.err (!%p1037_p7)
}
  0x15   :  { %s1298_s27 = smov 128   ;;  %s1299_s28 = smov 8  }
  0x16   :  { %44 = dma.hbm_to_vmem [thread:$0]  %s1578_s1, 512, %s39_s18, [#allocation6], %s1298_s27, %s1298_s27, %s1299_s28  }
  0x17   :  { %s1300_s12 = smov [#allocation8]   ;;  %s1301_s14 = smov [#allocation11]  }
  0x18   :  { %s60_s13 = sshll.u32 %s1300_s12, 4  ;;  %s82_s15 = sshll.u32 %s1301_s14, 4  ;;  %s61_s13 = int_to_ptr.vmem [resolvable:$true] %s60_s13  ;;  %s83_s15 = int_to_ptr.vmem [resolvable:$true] %s82_s15 }
  0x19   :  { %s1041_s19 = scalar_lea.hbm %s1580_s3, 2048 }
  0x1a   :  { %p1042_p8 = scmp.ne.s32.totalorder %s1580_s3, %s1041_s19  ;;  %p1045_p9 = scmp.lt.u32.totalorder %s1041_s19, %s1580_s3 }
  0x1c   :  { %p1047_p10 = pnand %p1045_p9, %p1042_p8 }
  0x1e   :  { %1050 = shalt.err (!%p1047_p10)
}
  0x1f   :  { %s1051_s1 = scalar_lea.vmem %s61_s13, 2048  ;;  %p1056_p12 = scmp.lt.s32.totalorder %s61_s13, %s61_s13 }
  0x20   :  { %p1052_p11 = scmp.ne.s32.totalorder %s61_s13, %s1051_s1  ;;  %p1057_p13 = scmp.lt.s32.totalorder %s1051_s1, %s1051_s1 }
  0x22   :  { %p1058_p0 = por %p1057_p13, %p1056_p12 }
  0x24   :  { %p1059_p1 = pnand %p1058_p0, %p1052_p11 }
  0x26   :  { %1062 = shalt.err (!%p1059_p1)
}
  0x27   :  { %66 = dma.hbm_to_vmem [thread:$0]  %s1580_s3, 2048, %s61_s13, [#allocation9], %s1298_s27, %s1298_s27, %s1299_s28  }
  0x28   :  { %s1063_s29 = scalar_lea.hbm %s1582_s5, 2048 }
  0x29   :  { %p1064_p2 = scmp.ne.s32.totalorder %s1582_s5, %s1063_s29  ;;  %p1067_p3 = scmp.lt.u32.totalorder %s1063_s29, %s1582_s5 }
  0x2b   :  { %p1069_p4 = pnand %p1067_p3, %p1064_p2 }
  0x2d   :  { %1072 = shalt.err (!%p1069_p4)
}
  0x2e   :  { %s1073_s17 = scalar_lea.vmem %s83_s15, 2048  ;;  %p1078_p6 = scmp.lt.s32.totalorder %s83_s15, %s83_s15 }
  0x2f   :  { %p1074_p5 = scmp.ne.s32.totalorder %s83_s15, %s1073_s17  ;;  %p1079_p7 = scmp.lt.s32.totalorder %s1073_s17, %s1073_s17 }
  0x31   :  { %p1080_p8 = por %p1079_p7, %p1078_p6 }
  0x33   :  { %p1081_p9 = pnand %p1080_p8, %p1074_p5 }
  0x35   :  { %1084 = shalt.err (!%p1081_p9)
}
  0x36   :  { %88 = dma.hbm_to_vmem [thread:$0]  %s1582_s5, 2048, %s83_s15, [#allocation12], %s1298_s27, %s1298_s27, %s1299_s28  }
  0x37   :  { %s1302_s19 = smov [#allocation14]   ;;  %s1303_s21 = smov [#allocation17]  }
  0x38   :  { %s104_s20 = sshll.u32 %s1302_s19, 4  ;;  %s126_s22 = sshll.u32 %s1303_s21, 4  ;;  %s105_s20 = int_to_ptr.vmem [resolvable:$true] %s104_s20  ;;  %s127_s22 = int_to_ptr.vmem [resolvable:$true] %s126_s22 }
  0x39   :  { %s1085_s18 = scalar_lea.hbm %s1584_s7, 2048 }
  0x3a   :  { %p1086_p10 = scmp.ne.s32.totalorder %s1584_s7, %s1085_s18  ;;  %p1089_p11 = scmp.lt.u32.totalorder %s1085_s18, %s1584_s7 }
  0x3c   :  { %p1091_p12 = pnand %p1089_p11, %p1086_p10 }
  0x3e   :  { %1094 = shalt.err (!%p1091_p12)
}
  0x3f   :  { %s1095_s5 = scalar_lea.vmem %s105_s20, 2048  ;;  %p1100_p0 = scmp.lt.s32.totalorder %s105_s20, %s105_s20 }
  0x40   :  { %p1096_p13 = scmp.ne.s32.totalorder %s105_s20, %s1095_s5  ;;  %p1101_p1 = scmp.lt.s32.totalorder %s1095_s5, %s1095_s5 }
  0x42   :  { %p1102_p2 = por %p1101_p1, %p1100_p0 }
  0x44   :  { %p1103_p3 = pnand %p1102_p2, %p1096_p13 }
  0x46   :  { %1106 = shalt.err (!%p1103_p3)
}
  0x47   :  { %110 = dma.hbm_to_vmem [thread:$0]  %s1584_s7, 2048, %s105_s20, [#allocation15], %s1298_s27, %s1298_s27, %s1299_s28  }
  0x48   :  { %s1107_s16 = scalar_lea.hbm %s1586_s9, 2048 }
  0x49   :  { %p1108_p4 = scmp.ne.s32.totalorder %s1586_s9, %s1107_s16  ;;  %p1111_p5 = scmp.lt.u32.totalorder %s1107_s16, %s1586_s9 }
  0x4b   :  { %p1113_p6 = pnand %p1111_p5, %p1108_p4 }
  0x4d   :  { %1116 = shalt.err (!%p1113_p6)
}
  0x4e   :  { %s1117_s21 = scalar_lea.vmem %s127_s22, 2048  ;;  %p1122_p8 = scmp.lt.s32.totalorder %s127_s22, %s127_s22 }
  0x4f   :  { %p1118_p7 = scmp.ne.s32.totalorder %s127_s22, %s1117_s21  ;;  %p1123_p9 = scmp.lt.s32.totalorder %s1117_s21, %s1117_s21 }
  0x51   :  { %p1124_p10 = por %p1123_p9, %p1122_p8 }
  0x53   :  { %p1125_p11 = pnand %p1124_p10, %p1118_p7 }
  0x55   :  { %1128 = shalt.err (!%p1125_p11)
}
  0x56   :  { %132 = dma.hbm_to_vmem [thread:$0]  %s1586_s9, 2048, %s127_s22, [#allocation18], %s1298_s27, %s1298_s27, %s1299_s28  }
  0x57   :  { %s1304_s23 = smov [#allocation2]   ;;  %s1305_s18 = smov [#allocation7]  }
  0x58   :  { %s29_s1 = sshll.u32 %s1304_s23, 4  ;;  %s51_s24 = sshll.u32 %s1305_s18, 4  ;;  %s30_s1 = int_to_ptr.vmem [resolvable:$true] %s29_s1  ;;  %s52_s24 = int_to_ptr.vmem [resolvable:$true] %s51_s24 }
  0x59   :  { %s1129_s29 = scalar_lea.hbm %s1577_s0, 128 }
  0x5a   :  { %p1130_p12 = scmp.ne.s32.totalorder %s1577_s0, %s1129_s29  ;;  %p1133_p13 = scmp.lt.u32.totalorder %s1129_s29, %s1577_s0 }
  0x5c   :  { %p1135_p0 = pnand %p1133_p13, %p1130_p12 }
  0x5e   :  { %1138 = shalt.err (!%p1135_p0)
}
  0x5f   :  { %s1139_s9 = scalar_lea.vmem %s30_s1, 128  ;;  %p1144_p2 = scmp.lt.s32.totalorder %s30_s1, %s30_s1 }
  0x60   :  { %p1140_p1 = scmp.ne.s32.totalorder %s30_s1, %s1139_s9  ;;  %p1145_p3 = scmp.lt.s32.totalorder %s1139_s9, %s1139_s9 }
  0x62   :  { %p1146_p4 = por %p1145_p3, %p1144_p2 }
  0x64   :  { %p1147_p5 = pnand %p1146_p4, %p1140_p1 }
  0x66   :  { %1150 = shalt.err (!%p1147_p5)
}
  0x67   :  { %32 = dma.hbm_to_vmem [thread:$0]  %s1577_s0, 128, %s30_s1, [#allocation3]  }
  0x68   :  { %s1151_s16 = scalar_lea.hbm %s1579_s2, 16 }
  0x69   :  { %p1152_p6 = scmp.ne.s32.totalorder %s1579_s2, %s1151_s16  ;;  %p1155_p7 = scmp.lt.u32.totalorder %s1151_s16, %s1579_s2 }
  0x6b   :  { %p1157_p8 = pnand %p1155_p7, %p1152_p6 }
  0x6d   :  { %1160 = shalt.err (!%p1157_p8)
}
  0x6e   :  { %s1161_s21 = scalar_lea.vmem %s52_s24, 16  ;;  %s1165_s7 = scalar_lea.vmem %s52_s24, 32 }
  0x6f   :  { %p1162_p9 = scmp.ne.s32.totalorder %s52_s24, %s1161_s21  ;;  %p1166_p10 = scmp.lt.s32.totalorder %s52_s24, %s52_s24 }
  0x70   :  { %p1167_p11 = scmp.lt.s32.totalorder %s1165_s7, %s1161_s21 }
  0x72   :  { %p1168_p12 = por %p1167_p11, %p1166_p10 }
  0x74   :  { %p1169_p13 = pnand %p1168_p12, %p1162_p9 }
  0x76   :  { %1172 = shalt.err (!%p1169_p13)
}
  0x77   :  { %54 = dma.hbm_to_vmem [thread:$0]  %s1579_s2, 16, %s52_s24, [#allocation6]  }
  0x78   :  { %s1306_s23 = smov [#allocation10]   ;;  %s1307_s18 = smov [#allocation13]  }
  0x79   :  { %s73_s1 = sshll.u32 %s1306_s23, 4  ;;  %s95_s25 = sshll.u32 %s1307_s18, 4  ;;  %s74_s1 = int_to_ptr.vmem [resolvable:$true] %s73_s1  ;;  %s96_s25 = int_to_ptr.vmem [resolvable:$true] %s95_s25 }
  0x7a   :  { %s1173_s5 = scalar_lea.hbm %s1581_s4, 16 }
  0x7b   :  { %p1174_p0 = scmp.ne.s32.totalorder %s1581_s4, %s1173_s5  ;;  %p1177_p1 = scmp.lt.u32.totalorder %s1173_s5, %s1581_s4 }
  0x7d   :  { %p1179_p2 = pnand %p1177_p1, %p1174_p0 }
  0x7f   :  { %1182 = shalt.err (!%p1179_p2)
}
  0x80   :  { %s1183_s2 = scalar_lea.vmem %s74_s1, 16  ;;  %s1187_s24 = scalar_lea.vmem %s74_s1, 32 }
  0x81   :  { %p1184_p3 = scmp.ne.s32.totalorder %s74_s1, %s1183_s2  ;;  %p1188_p4 = scmp.lt.s32.totalorder %s74_s1, %s74_s1 }
  0x82   :  { %p1189_p5 = scmp.lt.s32.totalorder %s1187_s24, %s1183_s2 }
  0x84   :  { %p1190_p6 = por %p1189_p5, %p1188_p4 }
  0x86   :  { %p1191_p7 = pnand %p1190_p6, %p1184_p3 }
  0x88   :  { %1194 = shalt.err (!%p1191_p7)
}
  0x89   :  { %76 = dma.hbm_to_vmem [thread:$0]  %s1581_s4, 16, %s74_s1, [#allocation9]  }
  0x8a   :  { %s1195_s16 = scalar_lea.hbm %s1583_s6, 16 }
  0x8b   :  { %p1196_p8 = scmp.ne.s32.totalorder %s1583_s6, %s1195_s16  ;;  %p1199_p9 = scmp.lt.u32.totalorder %s1195_s16, %s1583_s6 }
  0x8d   :  { %p1201_p10 = pnand %p1199_p9, %p1196_p8 }
  0x8f   :  { %1204 = shalt.err (!%p1201_p10)
}
  0x90   :  { %s1205_s21 = scalar_lea.vmem %s96_s25, 16  ;;  %s1209_s7 = scalar_lea.vmem %s96_s25, 32 }
  0x91   :  { %p1206_p11 = scmp.ne.s32.totalorder %s96_s25, %s1205_s21  ;;  %p1210_p12 = scmp.lt.s32.totalorder %s96_s25, %s96_s25 }
  0x92   :  { %p1211_p13 = scmp.lt.s32.totalorder %s1209_s7, %s1205_s21 }
  0x94   :  { %p1212_p0 = por %p1211_p13, %p1210_p12 }
  0x96   :  { %p1213_p1 = pnand %p1212_p0, %p1206_p11 }
  0x98   :  { %1216 = shalt.err (!%p1213_p1)
}
  0x99   :  { %98 = dma.hbm_to_vmem [thread:$0]  %s1583_s6, 16, %s96_s25, [#allocation12]  }
  0x9a   :  { %s1308_s20 = smov [#allocation16]   ;;  %s1309_s1 = smov [#allocation19]  }
  0x9b   :  { %s117_s23 = sshll.u32 %s1308_s20, 4  ;;  %s139_s18 = sshll.u32 %s1309_s1, 4  ;;  %s118_s23 = int_to_ptr.vmem [resolvable:$true] %s117_s23  ;;  %s140_s18 = int_to_ptr.vmem [resolvable:$true] %s139_s18 }
  0x9c   :  { %s1217_s5 = scalar_lea.hbm %s1585_s8, 16 }
  0x9d   :  { %p1218_p2 = scmp.ne.s32.totalorder %s1585_s8, %s1217_s5  ;;  %p1221_p3 = scmp.lt.u32.totalorder %s1217_s5, %s1585_s8 }
  0x9f   :  { %p1223_p4 = pnand %p1221_p3, %p1218_p2 }
  0xa1   :  { %1226 = shalt.err (!%p1223_p4)
}
  0xa2   :  { %s1227_s6 = scalar_lea.vmem %s118_s23, 16  ;;  %s1231_s25 = scalar_lea.vmem %s118_s23, 32 }
  0xa3   :  { %p1228_p5 = scmp.ne.s32.totalorder %s118_s23, %s1227_s6  ;;  %p1232_p6 = scmp.lt.s32.totalorder %s118_s23, %s118_s23 }
  0xa4   :  { %p1233_p7 = scmp.lt.s32.totalorder %s1231_s25, %s1227_s6 }
  0xa6   :  { %p1234_p8 = por %p1233_p7, %p1232_p6 }
  0xa8   :  { %p1235_p9 = pnand %p1234_p8, %p1228_p5 }
  0xaa   :  { %1238 = shalt.err (!%p1235_p9)
}
  0xab   :  { %120 = dma.hbm_to_vmem [thread:$0]  %s1585_s8, 16, %s118_s23, [#allocation15]  }
  0xac   :  { %s1239_s22 = scalar_lea.hbm %s1587_s10, 16 }
  0xad   :  { %p1240_p10 = scmp.ne.s32.totalorder %s1587_s10, %s1239_s22  ;;  %p1243_p11 = scmp.lt.u32.totalorder %s1239_s22, %s1587_s10 }
  0xaf   :  { %p1245_p12 = pnand %p1243_p11, %p1240_p10 }
  0xb1   :  { %1248 = shalt.err (!%p1245_p12)
}
  0xb2   :  { %s1249_s13 = scalar_lea.vmem %s140_s18, 16  ;;  %s1253_s19 = scalar_lea.vmem %s140_s18, 32 }
  0xb3   :  { %p1250_p13 = scmp.ne.s32.totalorder %s140_s18, %s1249_s13  ;;  %p1254_p0 = scmp.lt.s32.totalorder %s140_s18, %s140_s18 }
  0xb4   :  { %p1255_p1 = scmp.lt.s32.totalorder %s1253_s19, %s1249_s13 }
  0xb6   :  { %p1256_p2 = por %p1255_p1, %p1254_p0 }
  0xb8   :  { %p1257_p3 = pnand %p1256_p2, %p1250_p13 }
  0xba   :  { %1260 = shalt.err (!%p1257_p3)
}
  0xbb   :  { %142 = dma.hbm_to_vmem [thread:$0]  %s1587_s10, 16, %s140_s18, [#allocation18]  }
  0xbc   :  { %1283 = dma.done.wait [#allocation3], 128  }
  0xbd   :  { %1284 = vsyncadd [#allocation3], 4294967168 }
  0xbe   :  { %1285 = dma.done.wait [#allocation6], 528  }
  0xbf   :  { %1286 = vsyncadd [#allocation6], 4294966768 }
  0xc0   :  { %1287 = dma.done.wait [#allocation9], 2064  }
  0xc1   :  { %1288 = vsyncadd [#allocation9], 4294965232 }
  0xc2   :  { %1289 = dma.done.wait [#allocation12], 2064  }
  0xc3   :  { %1290 = vsyncadd [#allocation12], 4294965232 }
  0xc4   :  { %1291 = dma.done.wait [#allocation15], 2064  }
  0xc5   :  { %1292 = vsyncadd [#allocation15], 4294965232 }
  0xc6   :  { %1293 = dma.done.wait [#allocation18], 2064  }
  0xc7   :  { %1294 = vsyncadd [#allocation18], 4294965232  ;;  %v1310_v0 = vmov 0.0|0.0   ;;  %vm1311_vm0 = vmmov 0   ;;  %v1312_v1 = vmov 0.0   ;;  %v177_v2 = vld [vmem:[#allocation5] sm:$0xff] }
  0xc8   :  { %890 = vmatprep.subr.bf16.mxu0 %v1310_v0  ;;  %747 = vmatprep.mubr.msk.f32.mxu0 %vm1311_vm0, %v1312_v1  ;;  %v178_v3 = vld [vmem:[#allocation5 + $0x8] sm:$0xff]  ;;  %v179_v4 = vld [vmem:[#allocation5 + $0x10] sm:$0xff]  ;;  %v180_v6 = vld [vmem:[#allocation5 + $0x18] sm:$0xff]  ;;  %vm188_vm1 = vcmask 261120   ;;  %s1313_s10 = smov [#allocation20]  }
  0xc9   :  { %896 = vmatprep.subr.bf16.mxu1 %v1310_v0  ;;  %782 = vmatprep.mubr.msk.f32.mxu1 %vm1311_vm0, %v1312_v1  ;;  %v891_v5 = vpack.c.bf16 %v178_v3, %v177_v2  ;;  %v263_v7 = vld [vmem:[#allocation8] sm:$0xff]  ;;  %v264_v8 = vld [vmem:[#allocation8 + $0x8] sm:$0xff]  ;;  %v265_v9 = vld [vmem:[#allocation8 + $0x10] sm:$0xff]  ;;  %v894_v11 = vpack.c.bf16 %v180_v6, %v179_v4  ;;  %s646_s7 = sshll.u32 %s1313_s10, 4  ;;  %s647_s7 = int_to_ptr.vmem [resolvable:$true] %s646_s7 }
  0xca   :  { %v266_v10 = vld [vmem:[#allocation8 + $0x18] sm:$0xff]  ;;  %v897_v12 = vpack.c.bf16 %v264_v8, %v263_v7  ;;  %v267_v14 = vld [vmem:[#allocation8 + $0x20] sm:$0xff]  ;;  %v268_v15 = vld [vmem:[#allocation8 + $0x28] sm:$0xff]  ;;  %s1261_s4 = scalar_lea.vmem %s647_s7, 128  ;;  %p1266_p5 = scmp.lt.s32.totalorder %s647_s7, %s647_s7 }
  0xcb   :  { %892 = vmatpush3.bf16.msra.mxu0 %v891_v5  ;;  %v900_v13 = vpack.c.bf16 %v266_v10, %v265_v9  ;;  %v176_v16 = vld [vmem:[#allocation2] sm:$0xff]  ;;  %v903_v17 = vpack.c.bf16 %v268_v15, %v267_v14  ;;  %v271_v21 = vld [vmem:[#allocation8 + $0x40] sm:$0xff]  ;;  %v272_v22 = vld [vmem:[#allocation8 + $0x48] sm:$0xff]  ;;  %p1262_p4 = scmp.ne.s32.totalorder %s647_s7, %s1261_s4  ;;  %p1267_p6 = scmp.lt.s32.totalorder %s1261_s4, %s1261_s4 }
  0xcc   :  { %893 = vmatprep.subr.bf16.mxu0 %v1310_v0  ;;  %898 = vmatpush3.bf16.msra.mxu1 %v897_v12  ;;  %v269_v18 = vld [vmem:[#allocation8 + $0x30] sm:$0xff]  ;;  %v270_v19 = vld [vmem:[#allocation8 + $0x38] sm:$0xff]  ;;  %v909_v23 = vpack.c.bf16 %v272_v22, %v271_v21  ;;  %v275_v27 = vld [vmem:[#allocation8 + $0x60] sm:$0xff] }
  0xcd   :  { %899 = vmatprep.subr.bf16.mxu1 %v1310_v0  ;;  %v906_v20 = vpack.c.bf16 %v270_v19, %v269_v18  ;;  %v273_v24 = vld [vmem:[#allocation8 + $0x50] sm:$0xff]  ;;  %v274_v25 = vld [vmem:[#allocation8 + $0x58] sm:$0xff]  ;;  %v276_v28 = vld [vmem:[#allocation8 + $0x68] sm:$0xff]  ;;  %p1268_p7 = por %p1267_p6, %p1266_p5 }
  0xce   :  { %v912_v26 = vpack.c.bf16 %v274_v25, %v273_v24  ;;  %v915_v29 = vpack.c.bf16 %v276_v28, %v275_v27  ;;  %v277_v30 = vld [vmem:[#allocation8 + $0x70] sm:$0xff]  ;;  %v278_v31 = vld [vmem:[#allocation8 + $0x78] sm:$0xff]  ;;  %v357_v33 = vld [vmem:[#allocation11] sm:$0xff] }
  0xcf   :  { %895 = vmatpush3.bf16.msra.mxu0 %v894_v11  ;;  %v918_v32 = vpack.c.bf16 %v278_v31, %v277_v30  ;;  %v358_v34 = vld [vmem:[#allocation11 + $0x8] sm:$0xff]  ;;  %v359_v35 = vld [vmem:[#allocation11 + $0x10] sm:$0xff]  ;;  %v360_v37 = vld [vmem:[#allocation11 + $0x18] sm:$0xff]  ;;  %p1269_p8 = pnand %p1268_p7, %p1262_p4 }
  0xd0   :  { %920 = vmatprep.subr.bf16.mxu0 %v1310_v0  ;;  %901 = vmatpush3.bf16.msra.mxu1 %v900_v13  ;;  %v921_v36 = vpack.c.bf16 %v358_v34, %v357_v33  ;;  %v924_v38 = vpack.c.bf16 %v360_v37, %v359_v35  ;;  %v361_v39 = vld [vmem:[#allocation11 + $0x20] sm:$0xff]  ;;  %v362_v40 = vld [vmem:[#allocation11 + $0x28] sm:$0xff]  ;;  %v363_v42 = vld [vmem:[#allocation11 + $0x30] sm:$0xff] }
  0xd1   :  { %902 = vmatprep.subr.bf16.mxu1 %v1310_v0  ;;  %v927_v41 = vpack.c.bf16 %v362_v40, %v361_v39  ;;  %v364_v43 = vld [vmem:[#allocation11 + $0x38] sm:$0xff]  ;;  %v365_v45 = vld [vmem:[#allocation11 + $0x40] sm:$0xff]  ;;  %v366_v46 = vld [vmem:[#allocation11 + $0x48] sm:$0xff] }
  0xd2   :  { %748 = vmatmul.mubr.msk.f32.vlgmr.msra.gmra.mrb[0].mxu0 %vm188_vm1, %v176_v16  ;;  %v930_v44 = vpack.c.bf16 %v364_v43, %v363_v42  ;;  %v933_v47 = vpack.c.bf16 %v366_v46, %v365_v45  ;;  %v660_v48 = vld [vmem:[#allocation7] ss:$0 sm:$0xff]  ;;  %v367_v53 = vld [vmem:[#allocation11 + $0x50] sm:$0xff]  ;;  %v369_v56 = vld [vmem:[#allocation11 + $0x60] sm:$0xff] }
  0xd3   :  { %817 = vmatprep.mubr.msk.f32.mxu0 %vm1311_vm0, %v1312_v1  ;;  %922 = vmatpush3.bf16.msra.mxu0 %v921_v36  ;;  %v368_v54 = vld [vmem:[#allocation11 + $0x58] sm:$0xff]  ;;  %v370_v57 = vld [vmem:[#allocation11 + $0x68] sm:$0xff]  ;;  %v371_v59 = vld [vmem:[#allocation11 + $0x70] sm:$0xff] }
  0xd4   :  { %904 = vmatpush3.bf16.msra.mxu1 %v903_v17  ;;  %923 = vmatprep.subr.bf16.mxu0 %v1310_v0  ;;  %v936_v55 = vpack.c.bf16 %v368_v54, %v367_v53  ;;  %v939_v58 = vpack.c.bf16 %v370_v57, %v369_v56  ;;  %v372_v60 = vld [vmem:[#allocation11 + $0x78] sm:$0xff]  ;;  %v451_v62 = vld [vmem:[#allocation14] sm:$0xff]  ;;  %v452_v63 = vld [vmem:[#allocation14 + $0x8] sm:$0xff] }
  0xd5   :  { %905 = vmatprep.subr.bf16.mxu1 %v1310_v0  ;;  %v942_v61 = vpack.c.bf16 %v372_v60, %v371_v59  ;;  %v453_v2 = vld [vmem:[#allocation14 + $0x10] sm:$0xff]  ;;  %v945_v3 = vpack.c.bf16 %v452_v63, %v451_v62  ;;  %v454_v4 = vld [vmem:[#allocation14 + $0x18] sm:$0xff]  ;;  %v455_v6 = vld [vmem:[#allocation14 + $0x20] sm:$0xff] }
  0xd6   :  { %v948_v5 = vpack.c.bf16 %v454_v4, %v453_v2  ;;  %v456_v7 = vld [vmem:[#allocation14 + $0x28] sm:$0xff]  ;;  %v457_v9 = vld [vmem:[#allocation14 + $0x30] sm:$0xff]  ;;  %v458_v10 = vld [vmem:[#allocation14 + $0x38] sm:$0xff] }
  0xd7   :  { %925 = vmatpush3.bf16.msra.mxu0 %v924_v38  ;;  %v951_v8 = vpack.c.bf16 %v456_v7, %v455_v6  ;;  %v954_v11 = vpack.c.bf16 %v458_v10, %v457_v9  ;;  %v459_v12 = vld [vmem:[#allocation14 + $0x40] sm:$0xff]  ;;  %v460_v13 = vld [vmem:[#allocation14 + $0x48] sm:$0xff]  ;;  %v662_v15 = vld [vmem:[#allocation10] ss:$0 sm:$0xff] }
  0xd8   :  { %907 = vmatpush3.bf16.msra.mxu1 %v906_v20  ;;  %926 = vmatprep.subr.bf16.mxu0 %v1310_v0  ;;  %v957_v14 = vpack.c.bf16 %v460_v13, %v459_v12  ;;  %v461_v20 = vld [vmem:[#allocation14 + $0x50] sm:$0xff]  ;;  %v462_v21 = vld [vmem:[#allocation14 + $0x58] sm:$0xff]  ;;  %v464_v24 = vld [vmem:[#allocation14 + $0x68] sm:$0xff] }
  0xd9   :  { %908 = vmatprep.subr.bf16.mxu1 %v1310_v0  ;;  %v960_v22 = vpack.c.bf16 %v462_v21, %v461_v20  ;;  %v466_v27 = vld [vmem:[#allocation14 + $0x78] sm:$0xff]  ;;  %v546_v30 = vld [vmem:[#allocation17 + $0x8] sm:$0xff]  ;;  %v549_v34 = vld [vmem:[#allocation17 + $0x20] sm:$0xff] }
  0xda   :  { %v547_v31 = vld [vmem:[#allocation17 + $0x10] sm:$0xff]  ;;  %v550_v35 = vld [vmem:[#allocation17 + $0x28] sm:$0xff]  ;;  %v552_v38 = vld [vmem:[#allocation17 + $0x38] sm:$0xff] }
  0xdb   :  { %928 = vmatpush3.bf16.msra.mxu0 %v927_v41  ;;  %v975_v36 = vpack.c.bf16 %v550_v35, %v549_v34  ;;  %v551_v37 = vld [vmem:[#allocation17 + $0x30] sm:$0xff]  ;;  %v553_v40 = vld [vmem:[#allocation17 + $0x40] sm:$0xff]  ;;  %v554_v41 = vld [vmem:[#allocation17 + $0x48] sm:$0xff] }
  0xdc   :  { %910 = vmatpush3.bf16.msra.mxu1 %v909_v23  ;;  %929 = vmatprep.subr.bf16.mxu0 %v1310_v0  ;;  %v463_v23 = vld [vmem:[#allocation14 + $0x60] sm:$0xff]  ;;  %v978_v39 = vpack.c.bf16 %v552_v38, %v551_v37  ;;  %v981_v42 = vpack.c.bf16 %v554_v41, %v553_v40  ;;  %v663_v43 = vld [vmem:[#allocation13] ss:$0 sm:$0xff]  ;;  %v559_v54 = vld [vmem:[#allocation17 + $0x70] sm:$0xff] }
  0xdd   :  { %911 = vmatprep.subr.bf16.mxu1 %v1310_v0  ;;  %v963_v25 = vpack.c.bf16 %v464_v24, %v463_v23  ;;  %v664_v57 = vld [vmem:[#allocation16] ss:$0 sm:$0xff]  ;;  %v665_v62 = vld [vmem:[#allocation19] ss:$0 sm:$0xff] }
  0xdf   :  { %931 = vmatpush3.bf16.msra.mxu0 %v930_v44 }
  0xe0   :  { %913 = vmatpush3.bf16.msra.mxu1 %v912_v26  ;;  %932 = vmatprep.subr.bf16.mxu0 %v1310_v0  ;;  %v465_v26 = vld [vmem:[#allocation14 + $0x70] sm:$0xff] }
  0xe1   :  { %914 = vmatprep.subr.bf16.mxu1 %v1310_v0  ;;  %v966_v28 = vpack.c.bf16 %v466_v27, %v465_v26 }
  0xe3   :  { %934 = vmatpush3.bf16.msra.mxu0 %v933_v47 }
  0xe4   :  { %916 = vmatpush3.bf16.msra.mxu1 %v915_v29  ;;  %935 = vmatprep.subr.bf16.mxu0 %v1310_v0  ;;  %v545_v29 = vld [vmem:[#allocation17] sm:$0xff] }
  0xe5   :  { %917 = vmatprep.subr.bf16.mxu1 %v1310_v0 }
  0xe7   :  { %937 = vmatpush3.bf16.msra.mxu0 %v936_v55  ;;  %v560_v55 = vld [vmem:[#allocation17 + $0x78] sm:$0xff] }
  0xe8   :  { %919 = vmatpush3.bf16.msra.mxu1 %v918_v32  ;;  %938 = vmatprep.subr.bf16.mxu0 %v1310_v0  ;;  %v548_v32 = vld [vmem:[#allocation17 + $0x18] sm:$0xff]  ;;  %v990_v56 = vpack.c.bf16 %v560_v55, %v559_v54 }
  0xe9   :  { %944 = vmatprep.subr.bf16.mxu1 %v1310_v0  ;;  %v972_v33 = vpack.c.bf16 %v548_v32, %v547_v31 }
  0xeb   :  { %940 = vmatpush3.bf16.msra.mxu0 %v939_v58 }
  0xec   :  { %941 = vmatprep.subr.bf16.mxu0 %v1310_v0 }
  0xef   :  { %943 = vmatpush3.bf16.msra.mxu0 %v942_v61 }
  0xf0   :  { %968 = vmatprep.subr.bf16.mxu0 %v1310_v0 }
 0x1a5   :  { %v258_v49 = vpop.f32.mrb[0].mxu0 }
 0x1a6   :  { %v259_v50 = vadd.f32 %v660_v48, %v258_v49  ;;  %v749_v51 = vpop.f32.mrb[1].mxu0  ;;  %v555_v48 = vld [vmem:[#allocation17 + $0x50] sm:$0xff]  ;;  %v556_v49 = vld [vmem:[#allocation17 + $0x58] sm:$0xff] }
 0x1a7   :  { %v557_v51 = vld [vmem:[#allocation17 + $0x60] sm:$0xff] }
 0x1a8   :  { %1009 = vtanh.f32 %v259_v50  ;;  %v984_v50 = vpack.c.bf16 %v556_v49, %v555_v48 }
 0x1b2   :  { %v1010_v52 = vpop.eup %1009 }
 0x1b3   :  { %783 = vmatmul.mubr.f32.vlgmr.msra.gmra.mrb[0].mxu1 %v1010_v52  ;;  %v558_v52 = vld [vmem:[#allocation17 + $0x68] sm:$0xff] }
 0x1b4   :  { %852 = vmatprep.mubr.msk.f32.mxu1 %vm1311_vm0, %v1312_v1  ;;  %946 = vmatpush3.bf16.msra.mxu1 %v945_v3  ;;  %v987_v53 = vpack.c.bf16 %v558_v52, %v557_v51 }
 0x1b5   :  { %947 = vmatprep.subr.bf16.mxu1 %v1310_v0 }
 0x1b8   :  { %949 = vmatpush3.bf16.msra.mxu1 %v948_v5 }
 0x1b9   :  { %950 = vmatprep.subr.bf16.mxu1 %v1310_v0 }
 0x1bc   :  { %952 = vmatpush3.bf16.msra.mxu1 %v951_v8 }
 0x1bd   :  { %953 = vmatprep.subr.bf16.mxu1 %v1310_v0 }
 0x1c0   :  { %955 = vmatpush3.bf16.msra.mxu1 %v954_v11 }
 0x1c1   :  { %956 = vmatprep.subr.bf16.mxu1 %v1310_v0 }
 0x1c4   :  { %958 = vmatpush3.bf16.msra.mxu1 %v957_v14 }
 0x1c5   :  { %959 = vmatprep.subr.bf16.mxu1 %v1310_v0 }
 0x1c8   :  { %961 = vmatpush3.bf16.msra.mxu1 %v960_v22 }
 0x1c9   :  { %962 = vmatprep.subr.bf16.mxu1 %v1310_v0 }
 0x1cc   :  { %964 = vmatpush3.bf16.msra.mxu1 %v963_v25 }
 0x1cd   :  { %965 = vmatprep.subr.bf16.mxu1 %v1310_v0 }
 0x1d0   :  { %967 = vmatpush3.bf16.msra.mxu1 %v966_v28 }
 0x286   :  { %v352_v16 = vpop.f32.mrb[0].mxu1 }
 0x287   :  { %v353_v17 = vadd.f32 %v662_v15, %v352_v16  ;;  %v784_v18 = vpop.f32.mrb[1].mxu1 }
 0x289   :  { %1011 = vtanh.f32 %v353_v17 }
 0x293   :  { %v1012_v19 = vpop.eup %1011 }
 0x294   :  { %818 = vmatmul.mubr.f32.vlgmr.msra.gmra.mrb[2].mxu0 %v1012_v19 }
 0x295   :  { %887 = vmatprep.mubr.msk.f32.mxu0 %vm1311_vm0, %v1312_v1  ;;  %v969_v1 = vpack.c.bf16 %v546_v30, %v545_v29 }
 0x297   :  { %970 = vmatpush3.bf16.msra.mxu0 %v969_v1 }
 0x298   :  { %971 = vmatprep.subr.bf16.mxu0 %v1310_v0 }
 0x29b   :  { %973 = vmatpush3.bf16.msra.mxu0 %v972_v33 }
 0x29c   :  { %974 = vmatprep.subr.bf16.mxu0 %v1310_v0 }
 0x29f   :  { %976 = vmatpush3.bf16.msra.mxu0 %v975_v36 }
 0x2a0   :  { %977 = vmatprep.subr.bf16.mxu0 %v1310_v0 }
 0x2a3   :  { %979 = vmatpush3.bf16.msra.mxu0 %v978_v39 }
 0x2a4   :  { %980 = vmatprep.subr.bf16.mxu0 %v1310_v0 }
 0x2a7   :  { %982 = vmatpush3.bf16.msra.mxu0 %v981_v42 }
 0x2a8   :  { %983 = vmatprep.subr.bf16.mxu0 %v1310_v0 }
 0x2ab   :  { %985 = vmatpush3.bf16.msra.mxu0 %v984_v50 }
 0x2ac   :  { %986 = vmatprep.subr.bf16.mxu0 %v1310_v0 }
 0x2af   :  { %988 = vmatpush3.bf16.msra.mxu0 %v987_v53 }
 0x2b0   :  { %989 = vmatprep.subr.bf16.mxu0 %v1310_v0 }
 0x2b3   :  { %991 = vmatpush3.bf16.msra.mxu0 %v990_v56 }
 0x367   :  { %v446_v44 = vpop.f32.mrb[2].mxu0 }
 0x368   :  { %v447_v45 = vadd.f32 %v663_v43, %v446_v44  ;;  %v819_v46 = vpop.f32.mrb[3].mxu0 }
 0x36a   :  { %1013 = vtanh.f32 %v447_v45 }
 0x374   :  { %v1014_v47 = vpop.eup %1013 }
 0x375   :  { %853 = vmatmul.mubr.f32.vlgmr.msra.gmra.mrb[2].mxu1 %v1014_v47 }
 0x448   :  { %v540_v58 = vpop.f32.mrb[2].mxu1 }
 0x449   :  { %v541_v59 = vadd.f32 %v664_v57, %v540_v58  ;;  %v854_v60 = vpop.f32.mrb[3].mxu1 }
 0x44b   :  { %1015 = vtanh.f32 %v541_v59 }
 0x455   :  { %v1016_v61 = vpop.eup %1015 }
 0x456   :  { %888 = vmatmul.mubr.f32.vlgmr.msra.gmra.mrb[4].mxu0 %v1016_v61 }
 0x529   :  { %v634_v63 = vpop.f32.mrb[4].mxu0 }
 0x52a   :  { %v635_v2 = vadd.f32 %v665_v62, %v634_v63  ;;  %v889_v3 = vpop.f32.mrb[5].mxu0 }
 0x52c   :  { %1017 = vtanh.f32 %v635_v2 }
 0x536   :  { %v1018_v4 = vpop.eup %1017 }
 0x537   :  { %639 = vst [vmem:[#allocation20] sm:$0xff] %v1018_v4 }
 0x538   :  { %1272 = shalt.err (!%p1269_p8)
}
 0x539   :  { %s1273_s23 = scalar_lea.hbm %s1588_s11, 128 }
 0x53a   :  { %p1274_p9 = scmp.ne.s32.totalorder %s1588_s11, %s1273_s23  ;;  %p1277_p10 = scmp.lt.u32.totalorder %s1273_s23, %s1588_s11 }
 0x53c   :  { %p1279_p11 = pnand %p1277_p10, %p1274_p9 }
 0x53e   :  { %1282 = shalt.err (!%p1279_p11)
}
 0x53f   :  { %649 = dma.vmem_to_hbm [thread:$0]  %s647_s7, 128, %s1588_s11, [#allocation4]  }
 0x540   :  { %1295 = dma.done.wait [#allocation4], 128  }
 0x541   :  { %1296 = vsyncadd [#allocation4], 4294967168 }
 0x542   :  { %653 = vsyncpa [#allocation3], 1 }
 0x543   :  { %654 = vsyncpa [#allocation6], 1 }
 0x544   :  { %655 = vsyncpa [#allocation9], 1 }
 0x545   :  { %656 = vsyncpa [#allocation12], 1 }
 0x546   :  { %657 = vsyncpa [#allocation15], 1 }
 0x547   :  { %658 = vsyncpa [#allocation18], 1 }
 0x548   :  { %659 = vsyncpa [#allocation4], 1 }

</bundles_post_ra>
